<compile_context>
chip_gen: v7x
topology: tpu7x:2x2x1
jax: 0.10.0
libtpu: 0.0.40
codegen_flags: <defaults>
</compile_context>

<pallas_src>
import functools

import jax
import jax.numpy as jnp
from jax import lax
from jax.experimental import pallas as pl
from jax.experimental.pallas import tpu as pltpu


_F_CHUNK = 32  # F rows of counts built at once (bounds vreg pressure)


def _round_up(x, m):
    return (x + m - 1) // m * m


def fm_kernel(x_ref, rhs_ref, bias_ref, o_ref, acc_ref, counts_ref, *, l_pad):
    # x_ref:      (N, TB)          int32    feature ids, batch on lanes
    # rhs_ref:    (K_pad, F_SLAB)  bfloat16 fused table slab (see module docstring)
    # bias_ref:   (1,)             float32  in SMEM
    # o_ref:      (1, TB)          float32  lane-dense sigmoid output
    # acc_ref:    (K_pad, TB)      float32  VMEM accumulator over F slabs
    # counts_ref: (F_SLAB, TB)     bfloat16 VMEM counts staging buffer
    n, tb = x_ref.shape
    f_slab = rhs_ref.shape[1]
    num_chunks = f_slab // _F_CHUNK
    s = pl.program_id(1)
    slab_base = s * f_slab

    @pl.when(s == 0)
    def _():
        acc_ref[...] = jnp.zeros_like(acc_ref)

    # Build counts for this F slab in 32-row chunks: only a (32, TB) iota and
    # a (32, TB) f32 accumulator are live across the N loop (no full-slab
    # live set -> no spills through the vector-store slot).
    @pl.loop(0, num_chunks)
    def _(c):
        off = pl.multiple_of(c * _F_CHUNK, _F_CHUNK)
        fbase = slab_base + off
        iota = lax.broadcasted_iota(jnp.int32, (_F_CHUNK, tb), 0)

        def acc_counts(j, cnt):
            xj = x_ref[pl.ds(j, 1), :] - fbase              # (1, TB) int32
            return cnt + (xj == iota).astype(jnp.float32)

        counts = lax.fori_loop(
            0, n, acc_counts, jnp.zeros((_F_CHUNK, tb), jnp.float32),
            unroll=(True if n <= 8 else 8))
        # counts <= N <= 256, so the bf16 staging cast is exact.
        counts_ref[pl.ds(off, _F_CHUNK), :] = counts.astype(jnp.bfloat16)

    # One MXU matmul per (batch tile, F slab): bf16 operands, f32 accumulation.
    acc_ref[...] += jnp.dot(rhs_ref[...], counts_ref[...],
                            preferred_element_type=jnp.float32)

    @pl.when(s == pl.num_programs(1) - 1)
    def _():
        # ix = sum_l (sum_emb_l**2 - sum_sq_l); zero-padded rows contribute 0.
        sq = jnp.sum(acc_ref[0:l_pad, :] ** 2, axis=0, keepdims=True)
        ss = jnp.sum(acc_ref[l_pad:2 * l_pad, :], axis=0, keepdims=True)
        lin = acc_ref[2 * l_pad:2 * l_pad + 1, :]
        out = bias_ref[0] + lin + 0.5 * (sq - ss)
        o_ref[...] = jax.nn.sigmoid(out)


def fm_forward(x, emb_table, lin_table, bias, *, block_b=512):
    # x: (B, N) integer feature indices in [0, F)
    # emb_table: (F, L) f32; lin_table: (F, 1) f32; bias: (1,) f32
    B, N = x.shape
    F, L = emb_table.shape
    assert lin_table.shape == (F, 1), "only output_dim == 1 is supported"
    assert N <= 256, "bf16 counts staging requires <= 256 fields per example"

    L_pad = _round_up(L, 16)              # 16-aligned sections (bf16 sublane pairs)
    K_pad = _round_up(2 * L_pad + 1, 16)  # fused-column dim on sublanes

    # F slab = lane block of the fused table; grid reduces over slabs so the
    # VMEM footprint is fixed as F grows.
    F_slab = min(512, _round_up(F, 128))
    F_pad = _round_up(F, F_slab)

    # Batch tile on the 128-lane axis; prefer >= 2 grid steps so the
    # "parallel" batch axis can shard across v7x's two TensorCores.
    B_ceil = _round_up(B, 128)
    tb = min(_round_up(block_b, 128), B_ceil)
    if B_ceil // tb < 2 and B_ceil >= 256:
        tb = _round_up(B_ceil // 2, 128)
    B_pad = _round_up(B, tb)

    # Fused, transposed, padded RHS (built once in the wrapper; loop invariant).
    rhs_t = jnp.zeros((K_pad, F_pad), jnp.float32)
    rhs_t = rhs_t.at[0:L, :F].set(emb_table.T)
    rhs_t = rhs_t.at[L_pad:L_pad + L, :F].set((emb_table * emb_table).T)
    rhs_t = rhs_t.at[2 * L_pad, :F].set(lin_table[:, 0])
    rhs_t = rhs_t.astype(jnp.bfloat16)

    # Pad the batch with index 0 (a valid row; padded outputs are discarded)
    # and transpose so the batch maps to the 128-lane axis inside the kernel.
    # NOTE: this transpose is an extra HBM pass; fuse it into the producer of
    # x when B is large (accepted here because N is tiny).
    x_pad = jnp.zeros((B_pad, N), jnp.int32).at[:B, :].set(x.astype(jnp.int32))
    x_t = x_pad.T                                                  # (N, B_pad)

    grid = (B_pad // tb, F_pad // F_slab)
    kernel = functools.partial(fm_kernel, l_pad=L_pad)

    out = pl.pallas_call(
        kernel,
        out_shape=jax.ShapeDtypeStruct((1, B_pad), jnp.float32),
        grid_spec=pltpu.PrefetchScalarGridSpec(
            num_scalar_prefetch=0,
            grid=grid,
            in_specs=[
                pl.BlockSpec((N, tb), lambda i, s: (0, i)),          # indices
                pl.BlockSpec((K_pad, F_slab), lambda i, s: (0, s)),  # fused table
                pl.BlockSpec(memory_space=pltpu.MemorySpace.SMEM),   # bias
            ],
            out_specs=pl.BlockSpec((1, tb), lambda i, s: (0, i)),    # lane-dense
            scratch_shapes=[
                pltpu.VMEM((K_pad, tb), jnp.float32),     # P3 accumulator
                pltpu.VMEM((F_slab, tb), jnp.bfloat16),   # counts staging
            ],
        ),
        compiler_params=pltpu.CompilerParams(
            dimension_semantics=("parallel", "arbitrary")),
    )(x_t, rhs_t, bias.astype(jnp.float32))

    return out[0, :B].reshape(B, 1)


def fm_reference(x, emb_table, lin_table, bias):
    # Plain-JAX mirror of the PyTorch forward (for verification).
    second_x = emb_table[x]                               # (B, N, L)
    square_of_sum = jnp.sum(second_x, axis=1) ** 2        # (B, L)
    sum_of_square = jnp.sum(second_x ** 2, axis=1)        # (B, L)
    ix = jnp.sum(square_of_sum - sum_of_square, axis=1, keepdims=True)  # (B, 1)
    lin = jnp.sum(lin_table[x], axis=1)                   # (B, 1)
    out = bias + lin + 0.5 * ix
    return jax.nn.sigmoid(out)


if __name__ == "__main__":
    # Small, FM-consistent shapes.
    batch = 8
    feature_nums = 32     # embedding vocabulary size
    num_fields = 8        # number of feature slots per example
    latent_dims = 16
    output_dim = 1

    key = jax.random.PRNGKey(0)
    k_x, k_emb, k_lin = jax.random.split(key, 3)

    # Integer feature indices (what the PyTorch module actually consumes).
    x = jax.random.randint(
        k_x, (batch, num_fields), 0, feature_nums, dtype=jnp.int32)

    # feature_embedding: xavier_uniform_ init, shape (feature_nums, latent_dims)
    bound = (6.0 / (feature_nums + latent_dims)) ** 0.5
    emb_table = jax.random.uniform(
        k_emb, (feature_nums, latent_dims), jnp.float32, -bound, bound)
    # linear: nn.Embedding default init N(0, 1), shape (feature_nums, output_dim)
    lin_table = jax.random.normal(k_lin, (feature_nums, output_dim), jnp.float32)
    # bias: zeros, shape (output_dim,)
    bias = jnp.zeros((output_dim,), jnp.float32)

    pctrs = jax.block_until_ready(fm_forward(x, emb_table, lin_table, bias))
    expected = jax.block_until_ready(fm_reference(x, emb_table, lin_table, bias))

    assert pctrs.shape == (batch, output_dim)
    # bf16 MXU operands => table quantization; compare with a loosened tolerance.
    assert jnp.allclose(pctrs, expected, atol=2e-2, rtol=2e-2), (pctrs, expected)
    print("KERNEL_OK")
</pallas_src>

<mosaic_0001>
module attributes {stable_mosaic.version = 11 : i64} {
  func.func @fm_kernel(%arg0: i32, %arg1: i32, %arg2: memref<8x128xi32, #tpu.memory_space<vmem>>, %arg3: memref<48x128xbf16, #tpu.memory_space<vmem>>, %arg4: memref<1xf32, #tpu.memory_space<smem>>, %arg5: memref<1x128xf32, #tpu.memory_space<vmem>>, %arg6: memref<48x128xf32, #tpu.memory_space<vmem>>, %arg7: memref<128x128xbf16, #tpu.memory_space<vmem>>) attributes {dimension_semantics = [#tpu.dimension_semantics<parallel>, #tpu.dimension_semantics<arbitrary>], iteration_bounds = array<i64: 1, 1>, scalar_prefetch = 0 : i64, scratch_operands = 2 : i64, tpu.core_type = #tpu.core_type<tc>, window_params = [{transform_indices = @transform_0, window_bounds = array<i64: 8, 128>}, {transform_indices = @transform_1, window_bounds = array<i64: 48, 128>}, {transform_indices = @transform_2, window_bounds = array<i64: 1>}, {transform_indices = @transform_3, window_bounds = array<i64: 1, 128>}]} {
    %c128_i32 = arith.constant 128 : i32
    %0 = arith.muli %arg1, %c128_i32 : i32
    %c0_i32 = arith.constant 0 : i32
    %1 = arith.cmpi eq, %arg1, %c0_i32 : i32
    %2 = arith.extui %1 : i1 to i32
    %c0_i32_0 = arith.constant 0 : i32
    %3 = arith.cmpi ne, %2, %c0_i32_0 : i32
    scf.if %3 {
      %cst_12 = arith.constant 0.000000e+00 : f32
      %14 = vector.broadcast %cst_12 : f32 to vector<48x128xf32>
      %c0_13 = arith.constant 0 : index
      %c0_14 = arith.constant 0 : index
      %15 = vector.load %arg6[%c0_13, %c0_14] : memref<48x128xf32, #tpu.memory_space<vmem>>, vector<48x128xf32>
      tpu.vector_store %arg6[%c0_13, %c0_14], %14 {strides = array<i32>} : memref<48x128xf32, #tpu.memory_space<vmem>>, vector<48x128xf32>,
    } else {
    }
    %c0_i32_1 = arith.constant 0 : i32
    %c4_i32 = arith.constant 4 : i32
    %4 = arith.addi %c0_i32_1, %c4_i32 : i32
    %c1_i32 = arith.constant 1 : i32
    scf.for %arg8 = %c0_i32_1 to %4 step %c1_i32  : i32 {
      %c1_i32_12 = arith.constant 1 : i32
      %14 = arith.muli %arg8, %c1_i32_12 : i32
      %c0_i32_13 = arith.constant 0 : i32
      %15 = arith.addi %c0_i32_13, %14 : i32
      %c32_i32 = arith.constant 32 : i32
      %16 = arith.muli %15, %c32_i32 : i32
      %17 = tpu.assume_multiple %16, 32 : i32
      %18 = arith.addi %0, %17 : i32
      %19 = tpu.iota {dimensions = array<i32: 0>} : vector<32x128xi32>
      %cst_14 = arith.constant 0.000000e+00 : f32
      %20 = vector.broadcast %cst_14 : f32 to vector<32x128xf32>
      %c0_i32_15 = arith.constant 0 : i32
      %21 = arith.index_cast %c0_i32_15 : i32 to index
      %c0_16 = arith.constant 0 : index
      %22 = vector.load %arg2[%21, %c0_16] : memref<8x128xi32, #tpu.memory_space<vmem>>, vector<1x128xi32>
      %23 = vector.broadcast %18 : i32 to vector<1x128xi32>
      %24 = arith.subi %22, %23 : vector<1x128xi32>
      %25 = vector.broadcast %24 : vector<1x128xi32> to vector<32x128xi32>
      %26 = arith.cmpi eq, %25, %19 : vector<32x128xi32>
      %27 = arith.extui %26 : vector<32x128xi1> to vector<32x128xi32>
      %28 = arith.sitofp %27 : vector<32x128xi32> to vector<32x128xf32>
      %29 = arith.addf %20, %28 : vector<32x128xf32>
      %c1_i32_17 = arith.constant 1 : i32
      %30 = arith.index_cast %c1_i32_17 : i32 to index
      %c0_18 = arith.constant 0 : index
      %31 = vector.load %arg2[%30, %c0_18] : memref<8x128xi32, #tpu.memory_space<vmem>>, vector<1x128xi32>
      %32 = vector.broadcast %18 : i32 to vector<1x128xi32>
      %33 = arith.subi %31, %32 : vector<1x128xi32>
      %34 = vector.broadcast %33 : vector<1x128xi32> to vector<32x128xi32>
      %35 = arith.cmpi eq, %34, %19 : vector<32x128xi32>
      %36 = arith.extui %35 : vector<32x128xi1> to vector<32x128xi32>
      %37 = arith.sitofp %36 : vector<32x128xi32> to vector<32x128xf32>
      %38 = arith.addf %29, %37 : vector<32x128xf32>
      %c2_i32 = arith.constant 2 : i32
      %39 = arith.index_cast %c2_i32 : i32 to index
      %c0_19 = arith.constant 0 : index
      %40 = vector.load %arg2[%39, %c0_19] : memref<8x128xi32, #tpu.memory_space<vmem>>, vector<1x128xi32>
      %41 = vector.broadcast %18 : i32 to vector<1x128xi32>
      %42 = arith.subi %40, %41 : vector<1x128xi32>
      %43 = vector.broadcast %42 : vector<1x128xi32> to vector<32x128xi32>
      %44 = arith.cmpi eq, %43, %19 : vector<32x128xi32>
      %45 = arith.extui %44 : vector<32x128xi1> to vector<32x128xi32>
      %46 = arith.sitofp %45 : vector<32x128xi32> to vector<32x128xf32>
      %47 = arith.addf %38, %46 : vector<32x128xf32>
      %c3_i32 = arith.constant 3 : i32
      %48 = arith.index_cast %c3_i32 : i32 to index
      %c0_20 = arith.constant 0 : index
      %49 = vector.load %arg2[%48, %c0_20] : memref<8x128xi32, #tpu.memory_space<vmem>>, vector<1x128xi32>
      %50 = vector.broadcast %18 : i32 to vector<1x128xi32>
      %51 = arith.subi %49, %50 : vector<1x128xi32>
      %52 = vector.broadcast %51 : vector<1x128xi32> to vector<32x128xi32>
      %53 = arith.cmpi eq, %52, %19 : vector<32x128xi32>
      %54 = arith.extui %53 : vector<32x128xi1> to vector<32x128xi32>
      %55 = arith.sitofp %54 : vector<32x128xi32> to vector<32x128xf32>
      %56 = arith.addf %47, %55 : vector<32x128xf32>
      %c4_i32_21 = arith.constant 4 : i32
      %57 = arith.index_cast %c4_i32_21 : i32 to index
      %c0_22 = arith.constant 0 : index
      %58 = vector.load %arg2[%57, %c0_22] : memref<8x128xi32, #tpu.memory_space<vmem>>, vector<1x128xi32>
      %59 = vector.broadcast %18 : i32 to vector<1x128xi32>
      %60 = arith.subi %58, %59 : vector<1x128xi32>
      %61 = vector.broadcast %60 : vector<1x128xi32> to vector<32x128xi32>
      %62 = arith.cmpi eq, %61, %19 : vector<32x128xi32>
      %63 = arith.extui %62 : vector<32x128xi1> to vector<32x128xi32>
      %64 = arith.sitofp %63 : vector<32x128xi32> to vector<32x128xf32>
      %65 = arith.addf %56, %64 : vector<32x128xf32>
      %c5_i32 = arith.constant 5 : i32
      %66 = arith.index_cast %c5_i32 : i32 to index
      %c0_23 = arith.constant 0 : index
      %67 = vector.load %arg2[%66, %c0_23] : memref<8x128xi32, #tpu.memory_space<vmem>>, vector<1x128xi32>
      %68 = vector.broadcast %18 : i32 to vector<1x128xi32>
      %69 = arith.subi %67, %68 : vector<1x128xi32>
      %70 = vector.broadcast %69 : vector<1x128xi32> to vector<32x128xi32>
      %71 = arith.cmpi eq, %70, %19 : vector<32x128xi32>
      %72 = arith.extui %71 : vector<32x128xi1> to vector<32x128xi32>
      %73 = arith.sitofp %72 : vector<32x128xi32> to vector<32x128xf32>
      %74 = arith.addf %65, %73 : vector<32x128xf32>
      %c6_i32 = arith.constant 6 : i32
      %75 = arith.index_cast %c6_i32 : i32 to index
      %c0_24 = arith.constant 0 : index
      %76 = vector.load %arg2[%75, %c0_24] : memref<8x128xi32, #tpu.memory_space<vmem>>, vector<1x128xi32>
      %77 = vector.broadcast %18 : i32 to vector<1x128xi32>
      %78 = arith.subi %76, %77 : vector<1x128xi32>
      %79 = vector.broadcast %78 : vector<1x128xi32> to vector<32x128xi32>
      %80 = arith.cmpi eq, %79, %19 : vector<32x128xi32>
      %81 = arith.extui %80 : vector<32x128xi1> to vector<32x128xi32>
      %82 = arith.sitofp %81 : vector<32x128xi32> to vector<32x128xf32>
      %83 = arith.addf %74, %82 : vector<32x128xf32>
      %c7_i32 = arith.constant 7 : i32
      %84 = arith.index_cast %c7_i32 : i32 to index
      %c0_25 = arith.constant 0 : index
      %85 = vector.load %arg2[%84, %c0_25] : memref<8x128xi32, #tpu.memory_space<vmem>>, vector<1x128xi32>
      %86 = vector.broadcast %18 : i32 to vector<1x128xi32>
      %87 = arith.subi %85, %86 : vector<1x128xi32>
      %88 = vector.broadcast %87 : vector<1x128xi32> to vector<32x128xi32>
      %89 = arith.cmpi eq, %88, %19 : vector<32x128xi32>
      %90 = arith.extui %89 : vector<32x128xi1> to vector<32x128xi32>
      %91 = arith.sitofp %90 : vector<32x128xi32> to vector<32x128xf32>
      %92 = arith.addf %83, %91 : vector<32x128xf32>
      %c8_i32 = arith.constant 8 : i32
      %93 = arith.truncf %92 : vector<32x128xf32> to vector<32x128xbf16>
      %94 = arith.index_cast %17 : i32 to index
      %c0_26 = arith.constant 0 : index
      %95 = vector.load %arg7[%94, %c0_26] : memref<128x128xbf16, #tpu.memory_space<vmem>>, vector<32x128xbf16>
      tpu.vector_store %arg7[%94, %c0_26], %93 {strides = array<i32>} : memref<128x128xbf16, #tpu.memory_space<vmem>>, vector<32x128xbf16>,
    }
    %c4_i32_2 = arith.constant 4 : i32
    %c0 = arith.constant 0 : index
    %c0_3 = arith.constant 0 : index
    %5 = vector.load %arg6[%c0, %c0_3] : memref<48x128xf32, #tpu.memory_space<vmem>>, vector<48x128xf32>
    %c0_4 = arith.constant 0 : index
    %c0_5 = arith.constant 0 : index
    %6 = vector.load %arg3[%c0_4, %c0_5] : memref<48x128xbf16, #tpu.memory_space<vmem>>, vector<48x128xbf16>
    %c0_6 = arith.constant 0 : index
    %c0_7 = arith.constant 0 : index
    %7 = vector.load %arg7[%c0_6, %c0_7] : memref<128x128xbf16, #tpu.memory_space<vmem>>, vector<128x128xbf16>
    %cst = arith.constant dense<0.000000e+00> : vector<48x128xf32>
    %8 = tpu.matmul %6, %7, %cst {dimension_numbers = #tpu.dot_dimension_numbers<[1], [0], [0], [1], [0, 0, 1, 1], [], []>} : vector<48x128xbf16>, vector<128x128xbf16>, vector<48x128xf32> -> vector<48x128xf32>
    %9 = arith.addf %5, %8 : vector<48x128xf32>
    %c0_8 = arith.constant 0 : index
    %c0_9 = arith.constant 0 : index
    %10 = vector.load %arg6[%c0_8, %c0_9] : memref<48x128xf32, #tpu.memory_space<vmem>>, vector<48x128xf32>
    tpu.vector_store %arg6[%c0_8, %c0_9], %9 {strides = array<i32>} : memref<48x128xf32, #tpu.memory_space<vmem>>, vector<48x128xf32>,
    %c0_i32_10 = arith.constant 0 : i32
    %11 = arith.cmpi eq, %arg1, %c0_i32_10 : i32
    %12 = arith.extui %11 : i1 to i32
    %c0_i32_11 = arith.constant 0 : i32
    %13 = arith.cmpi ne, %12, %c0_i32_11 : i32
    scf.if %13 {
      %c0_12 = arith.constant 0 : index
      %c0_13 = arith.constant 0 : index
      %14 = vector.load %arg6[%c0_12, %c0_13] : memref<48x128xf32, #tpu.memory_space<vmem>>, vector<16x128xf32>
      %15 = arith.mulf %14, %14 : vector<16x128xf32>
      %cst_14 = arith.constant dense<0.000000e+00> : vector<128xf32>
      %16 = vector.multi_reduction <add>, %15, %cst_14 [0] : vector<16x128xf32> to vector<128xf32>
      %17 = vector.shape_cast %16 : vector<128xf32> to vector<1x128xf32>
      %c16 = arith.constant 16 : index
      %c0_15 = arith.constant 0 : index
      %18 = vector.load %arg6[%c16, %c0_15] : memref<48x128xf32, #tpu.memory_space<vmem>>, vector<16x128xf32>
      %cst_16 = arith.constant dense<0.000000e+00> : vector<128xf32>
      %19 = vector.multi_reduction <add>, %18, %cst_16 [0] : vector<16x128xf32> to vector<128xf32>
      %20 = vector.shape_cast %19 : vector<128xf32> to vector<1x128xf32>
      %c32 = arith.constant 32 : index
      %c0_17 = arith.constant 0 : index
      %21 = vector.load %arg6[%c32, %c0_17] : memref<48x128xf32, #tpu.memory_space<vmem>>, vector<1x128xf32>
      %c0_18 = arith.constant 0 : index
      %22 = memref.load %arg4[%c0_18] : memref<1xf32, #tpu.memory_space<smem>>
      %23 = vector.broadcast %22 : f32 to vector<1x128xf32>
      %24 = arith.addf %23, %21 : vector<1x128xf32>
      %25 = arith.subf %17, %20 : vector<1x128xf32>
      %cst_19 = arith.constant 5.000000e-01 : f32
      %26 = vector.broadcast %cst_19 : f32 to vector<1x128xf32>
      %27 = arith.mulf %26, %25 : vector<1x128xf32>
      %28 = arith.addf %24, %27 : vector<1x128xf32>
      %29 = arith.negf %28 : vector<1x128xf32>
      %30 = math.exp %29 : vector<1x128xf32>
      %cst_20 = arith.constant 1.000000e+00 : f32
      %31 = vector.broadcast %cst_20 : f32 to vector<1x128xf32>
      %32 = arith.addf %31, %30 : vector<1x128xf32>
      %33 = arith.divf %31, %32 : vector<1x128xf32>
      %c0_21 = arith.constant 0 : index
      %c0_22 = arith.constant 0 : index
      %34 = vector.load %arg5[%c0_21, %c0_22] : memref<1x128xf32, #tpu.memory_space<vmem>>, vector<1x128xf32>
      tpu.vector_store %arg5[%c0_21, %c0_22], %33 {strides = array<i32>} : memref<1x128xf32, #tpu.memory_space<vmem>>, vector<1x128xf32>,
    } else {
    }
    return
  }
  func.func @transform_0(%arg0: i32, %arg1: i32) -> (i32, i32) {
    %c0_i32 = arith.constant 0 : i32
    %c0_i32_0 = arith.constant 0 : i32
    return %c0_i32, %arg0 : i32, i32
  }
  func.func @transform_1(%arg0: i32, %arg1: i32) -> (i32, i32) {
    %c0_i32 = arith.constant 0 : i32
    %c0_i32_0 = arith.constant 0 : i32
    return %c0_i32, %arg1 : i32, i32
  }
  func.func @transform_2(%arg0: i32, %arg1: i32) -> i32 {
    %c0_i32 = arith.constant 0 : i32
    %c0_i32_0 = arith.constant 0 : i32
    return %c0_i32 : i32
  }
  func.func @transform_3(%arg0: i32, %arg1: i32) -> (i32, i32) {
    %c0_i32 = arith.constant 0 : i32
    %c0_i32_0 = arith.constant 0 : i32
    return %c0_i32, %arg0 : i32, i32
  }
}

</mosaic_0001>

<bundles_post_ra>
// kernel: tpu_custom_call.1
= control target key start
LH: loop header
LB: loop body
LE: loop exit
PB: predicated region body
PF: predicated region fallthrough
CT: control target
= control target key end

     0   :  { %s824_s0 = inlined_call_operand.hbm [shape: s32[8,128], index: 0, kind: input, shape index: {}]   ;;  %s825_s1 = inlined_call_operand.hbm [shape: bf16[48,128], index: 1, kind: input, shape index: {}]   ;;  %s826_s2 = inlined_call_operand.<no memory space> [shape: f32[1], index: 2, kind: input, shape index: {}]   ;;  %s827_s3 = inlined_call_operand.hbm [shape: f32[1,128], index: 3, kind: output, shape index: {}]  }
   0x1   :  { %8 = sst [smem:[#allocation4]] %s826_s2 }
   0x2   :  { %9 = vsyncpa [#allocation6], 0 }
   0x3   :  { %10 = vsyncpa [#allocation9], 0 }
   0x4   :  { %11 = vsyncpa [#allocation7], 0  ;;  %s615_s14 = smov [#allocation5]   ;;  %s616_s16 = smov [#allocation8]  }
   0x5   :  { %s18_s15 = sshll.u32 %s615_s14, 4  ;;  %s27_s17 = sshll.u32 %s616_s16, 4  ;;  %s19_s15 = int_to_ptr.vmem [resolvable:$true] %s18_s15  ;;  %s646_s17 = int_to_ptr.vmem [resolvable:$true] %s27_s17 }
   0x6   :  { %s535_s20 = scalar_lea.hbm %s824_s0, 128 }
   0x7   :  { %p536_p0 = scmp.ne.s32.totalorder %s824_s0, %s535_s20  ;;  %p539_p1 = scmp.lt.u32.totalorder %s535_s20, %s824_s0 }
   0x9   :  { %p541_p2 = pnand %p539_p1, %p536_p0 }
   0xb   :  { %544 = shalt.err (!%p541_p2)
}
   0xc   :  { %s545_s24 = scalar_lea.vmem %s19_s15, 128  ;;  %p550_p4 = scmp.lt.s32.totalorder %s19_s15, %s19_s15 }
   0xd   :  { %p546_p3 = scmp.ne.s32.totalorder %s19_s15, %s545_s24  ;;  %p551_p5 = scmp.lt.s32.totalorder %s545_s24, %s545_s24 }
   0xf   :  { %p552_p6 = por %p551_p5, %p550_p4 }
  0x11   :  { %p553_p7 = pnand %p552_p6, %p546_p3 }
  0x13   :  { %556 = shalt.err (!%p553_p7)
}
  0x14   :  { %21 = dma.hbm_to_vmem [thread:$0]  %s824_s0, 128, %s19_s15, [#allocation6]  }
  0x15   :  { %s557_s29 = scalar_lea.hbm %s825_s1, 384 }
  0x16   :  { %p558_p8 = scmp.ne.s32.totalorder %s825_s1, %s557_s29  ;;  %p561_p9 = scmp.lt.u32.totalorder %s557_s29, %s825_s1 }
  0x18   :  { %p563_p10 = pnand %p561_p9, %p558_p8 }
  0x1a   :  { %566 = shalt.err (!%p563_p10)
}
  0x1b   :  { %s567_s7 = scalar_lea.vmem %s646_s17, 384  ;;  %p572_p12 = scmp.lt.s32.totalorder %s646_s17, %s646_s17 }
  0x1c   :  { %p568_p11 = scmp.ne.s32.totalorder %s646_s17, %s567_s7  ;;  %p573_p13 = scmp.lt.s32.totalorder %s567_s7, %s567_s7 }
  0x1e   :  { %p574_p0 = por %p573_p13, %p572_p12 }
  0x20   :  { %p575_p1 = pnand %p574_p0, %p568_p11 }
  0x22   :  { %578 = shalt.err (!%p575_p1)
}
  0x23   :  { %s617_s0 = smov 64   ;;  %s618_s8 = smov 4  }
  0x24   :  { %33 = dma.hbm_to_vmem [thread:$0]  %s825_s1, 384, %s646_s17, [#allocation9], %s617_s0, %s617_s0, %s618_s8  }
  0x25   :  { %605 = dma.done.wait [#allocation6], 128  }
  0x26   :  { %606 = vsyncadd [#allocation6], 4294967168 }
  0x27   :  { %607 = dma.done.wait [#allocation9], 384  }
  0x28   :  { %608 = vsyncadd [#allocation9], 4294966912  ;;  %v619_v0 = vmov 0.0   ;;  %s683_s11 = smov 0  }
  0x29   :  { %48 = vst [vmem:[#allocation2] sm:$0xff] %v619_v0  ;;  %49 = vst [vmem:[#allocation2 + $0x8] sm:$0xff] %v619_v0 }
  0x2a   :  { %50 = vst [vmem:[#allocation2 + $0x10] sm:$0xff] %v619_v0  ;;  %51 = vst [vmem:[#allocation2 + $0x18] sm:$0xff] %v619_v0 }
  0x2b   :  { %52 = vst [vmem:[#allocation2 + $0x20] sm:$0xff] %v619_v0  ;;  %53 = vst [vmem:[#allocation2 + $0x28] sm:$0xff] %v619_v0 }
  0x2c LB: > { %v62_v1 = vlaneseq  ;;  %v67_v2 = vld [vmem:[#allocation5] sm:$0x1]  ;;  %v90_v3 = vld [vmem:[#allocation5 + $0x1] sm:$0x1]  ;;  %v112_v4 = vld [vmem:[#allocation5 + $0x2] sm:$0x1]  ;;  %s613_s11 = sphi %s683_s11, %s59_s11  }
  0x2d   : > { %s419_s1 = sshll.u32 %s613_s11, 5  ;;  %v134_v6 = vld [vmem:[#allocation5 + $0x3] sm:$0x1]  ;;  %v156_v7 = vld [vmem:[#allocation5 + $0x4] sm:$0x1]  ;;  %v620_v32 = vmov 0.0  }
  0x2e   : > { %v689_v5 = vshrl.u32 %v62_v1, 7  ;;  %v68_v8 = vstv %s419_s1  ;;  %v178_v9 = vld [vmem:[#allocation5 + $0x5] sm:$0x1]  ;;  %v200_v10 = vld [vmem:[#allocation5 + $0x6] sm:$0x1]  ;;  %s246_s12 = sshra.s32 %s419_s1, 4 }
  0x2f   : > { %v222_v11 = vld [vmem:[#allocation5 + $0x7] sm:$0x1]  ;;  %v69_v15 = vsub.s32 %v67_v2, %v68_v8  ;;  %v91_v17 = vsub.s32 %v90_v3, %v68_v8  ;;  %v113_v18 = vsub.s32 %v112_v4, %v68_v8  ;;  %v135_v19 = vsub.s32 %v134_v6, %v68_v8  ;;  %s452_s13 = sshll.u32 %s246_s12, 3  ;;  %s59_s11 = sadd.s32 1, %s613_s11  }
  0x30   : > { %v694_v12 = vadd.s32 8, %v689_v5  ;;  %v697_v13 = vadd.s32 16, %v689_v5  ;;  %v700_v14 = vadd.s32 24, %v689_v5  ;;  %v72_v16 = vsub.s32 0, %v689_v5  ;;  %s249_s14 = scalar_lea.vmem [#allocation3], %s452_s13  ;;  %p56_p2 = scmp.ge.s32.totalorder %s59_s11, 4  }
  0x31   : > { %v157_v20 = vsub.s32 %v156_v7, %v68_v8  ;;  %v179_v21 = vsub.s32 %v178_v9, %v68_v8  ;;  %v201_v22 = vsub.s32 %v200_v10, %v68_v8  ;;  %v223_v23 = vsub.s32 %v222_v11, %v68_v8  ;;  %468 = vmatprep.subr.bf16.mxu0 (%p56_p2), %v619_v0  ;;  %s383_s15 = sld [smem:[#allocation4]] (%p56_p2)  ;;  %s622_s16 = smov (%p56_p2), [#allocation10]  }
  0x32   : > { %v73_v24 = vrot.slane %v69_v15, %v72_v16  ;;  %v95_v25 = vrot.slane %v91_v17, %v72_v16  ;;  %v117_v26 = vrot.slane %v113_v18, %v72_v16  ;;  %v139_v27 = vrot.slane %v135_v19, %v72_v16  ;;  %496 = vmatprep.subr.bf16.mxu1 (%p56_p2), %v619_v0  ;;  %s402_s17 = sshll.u32 (%p56_p2), %s622_s16, 4  ;;  %s403_s17 = int_to_ptr.vmem [resolvable:$true] %s402_s17 }
  0x33   : > { %v161_v28 = vrot.slane %v157_v20, %v72_v16  ;;  %v703_v29 = vrot.slane %v179_v21, %v72_v16  ;;  %v705_v30 = vrot.slane %v201_v22, %v72_v16  ;;  %v707_v31 = vrot.slane %v223_v23, %v72_v16  ;;  %s579_s18 = scalar_lea.vmem (%p56_p2), %s403_s17, 16  ;;  %s583_s19 = scalar_lea.vmem (%p56_p2), %s403_s17, 32 }
  0x34   : > { %vm74_vm0 = vcmp.eq.s32.totalorder %v73_v24, %v689_v5  ;;  %vm75_vm1 = vcmp.eq.s32.totalorder %v73_v24, %v694_v12  ;;  %vm76_vm2 = vcmp.eq.s32.totalorder %v73_v24, %v697_v13  ;;  %vm77_vm3 = vcmp.eq.s32.totalorder %v73_v24, %v700_v14  ;;  %p580_p3 = scmp.ne.s32.totalorder (%p56_p2), %s403_s17, %s579_s18  ;;  %p584_p4 = scmp.lt.s32.totalorder (%p56_p2), %s403_s17, %s403_s17 }
  0x35   : > { %v420_v33 = vsel %vm74_vm0, 1.0, %v620_v32  ;;  %v421_v34 = vsel %vm75_vm1, 1.0, %v620_v32  ;;  %v422_v35 = vsel %vm76_vm2, 1.0, %v620_v32  ;;  %v423_v36 = vsel %vm77_vm3, 1.0, %v620_v32  ;;  %p585_p5 = scmp.lt.s32.totalorder (%p56_p2), %s583_s19, %s579_s18 }
  0x36   : > { %vm96_vm4 = vcmp.eq.s32.totalorder %v95_v25, %v689_v5  ;;  %vm97_vm5 = vcmp.eq.s32.totalorder %v95_v25, %v694_v12  ;;  %vm98_vm6 = vcmp.eq.s32.totalorder %v95_v25, %v697_v13  ;;  %vm99_vm7 = vcmp.eq.s32.totalorder %v95_v25, %v700_v14 }
  0x37   : > { %v424_v37 = vsel %vm96_vm4, 1.0, %v620_v32  ;;  %v425_v38 = vsel %vm97_vm5, 1.0, %v620_v32  ;;  %v426_v39 = vsel %vm98_vm6, 1.0, %v620_v32  ;;  %v427_v40 = vsel %vm99_vm7, 1.0, %v620_v32  ;;  %p586_p6 = por (%p56_p2), %p585_p5, %p584_p4 }
  0x38   : > { %v108_v41 = vadd.f32 %v424_v37, %v420_v33  ;;  %v109_v42 = vadd.f32 %v425_v38, %v421_v34  ;;  %v110_v43 = vadd.f32 %v426_v39, %v422_v35  ;;  %v111_v44 = vadd.f32 %v427_v40, %v423_v36  ;;  %v528_v40 = vld [vmem:[#allocation8] sm:$0xff] (%p56_p2)  }
  0x39   : > { %vm118_vm8 = vcmp.eq.s32.totalorder %v117_v26, %v689_v5  ;;  %vm119_vm9 = vcmp.eq.s32.totalorder %v117_v26, %v694_v12  ;;  %vm120_vm10 = vcmp.eq.s32.totalorder %v117_v26, %v697_v13  ;;  %vm121_vm11 = vcmp.eq.s32.totalorder %v117_v26, %v700_v14  ;;  %p587_p7 = pnand (%p56_p2), %p586_p6, %p580_p3 }
  0x3a   : > { %v428_v45 = vsel %vm118_vm8, 1.0, %v620_v32  ;;  %v429_v46 = vsel %vm119_vm9, 1.0, %v620_v32  ;;  %v430_v47 = vsel %vm120_vm10, 1.0, %v620_v32  ;;  %v431_v48 = vsel %vm121_vm11, 1.0, %v620_v32 }
  0x3b   : > { %v130_v49 = vadd.f32 %v428_v45, %v108_v41  ;;  %v131_v50 = vadd.f32 %v429_v46, %v109_v42  ;;  %v132_v51 = vadd.f32 %v430_v47, %v110_v43  ;;  %v133_v52 = vadd.f32 %v431_v48, %v111_v44  ;;  %v529_v41 = vld [vmem:[#allocation8 + $0x8] sm:$0xff] (%p56_p2)   ;;  %v530_v42 = vld [vmem:[#allocation8 + $0x10] sm:$0xff] (%p56_p2)   ;;  %v254_v44 = vld [vmem:[#allocation2 + $0x10] sm:$0xff] (%p56_p2) }
  0x3c   : > { %vm140_vm12 = vcmp.eq.s32.totalorder %v139_v27, %v689_v5  ;;  %vm141_vm13 = vcmp.eq.s32.totalorder %v139_v27, %v694_v12  ;;  %vm142_vm14 = vcmp.eq.s32.totalorder %v139_v27, %v697_v13  ;;  %vm143_vm15 = vcmp.eq.s32.totalorder %v139_v27, %v700_v14  ;;  %v252_v43 = vld [vmem:[#allocation2] sm:$0xff] (%p56_p2)  ;;  %v253_v47 = vld [vmem:[#allocation2 + $0x8] sm:$0xff] (%p56_p2)  ;;  %v255_v48 = vld [vmem:[#allocation2 + $0x18] sm:$0xff] (%p56_p2) }
  0x3d   : > { %v432_v53 = vsel %vm140_vm12, 1.0, %v620_v32  ;;  %v433_v54 = vsel %vm141_vm13, 1.0, %v620_v32  ;;  %v434_v55 = vsel %vm142_vm14, 1.0, %v620_v32  ;;  %v435_v56 = vsel %vm143_vm15, 1.0, %v620_v32 }
  0x3e   : > { %v152_v57 = vadd.f32 %v432_v53, %v130_v49  ;;  %v153_v58 = vadd.f32 %v433_v54, %v131_v50  ;;  %v154_v59 = vadd.f32 %v434_v55, %v132_v51  ;;  %v155_v60 = vadd.f32 %v435_v56, %v133_v52 }
  0x3f   : > { %vm162_vm0 = vcmp.eq.s32.totalorder %v161_v28, %v689_v5  ;;  %vm163_vm1 = vcmp.eq.s32.totalorder %v161_v28, %v694_v12  ;;  %vm164_vm2 = vcmp.eq.s32.totalorder %v161_v28, %v697_v13  ;;  %vm165_vm3 = vcmp.eq.s32.totalorder %v161_v28, %v700_v14 }
  0x40   : > { %v436_v61 = vsel %vm162_vm0, 1.0, %v620_v32  ;;  %v437_v62 = vsel %vm163_vm1, 1.0, %v620_v32  ;;  %v438_v63 = vsel %vm164_vm2, 1.0, %v620_v32  ;;  %v439_v1 = vsel %vm165_vm3, 1.0, %v620_v32 }
  0x41   : > { %v174_v2 = vadd.f32 %v436_v61, %v152_v57  ;;  %v175_v3 = vadd.f32 %v437_v62, %v153_v58  ;;  %v176_v4 = vadd.f32 %v438_v63, %v154_v59  ;;  %v177_v6 = vadd.f32 %v439_v1, %v155_v60  ;;  %v256_v61 = vld [vmem:[#allocation2 + $0x20] sm:$0xff] (%p56_p2) }
  0x42   : > { %vm184_vm4 = vcmp.eq.s32.totalorder %v703_v29, %v689_v5  ;;  %vm185_vm5 = vcmp.eq.s32.totalorder %v703_v29, %v694_v12  ;;  %vm186_vm6 = vcmp.eq.s32.totalorder %v703_v29, %v697_v13  ;;  %vm187_vm7 = vcmp.eq.s32.totalorder %v703_v29, %v700_v14 }
  0x43   : > { %v440_v7 = vsel %vm184_vm4, 1.0, %v620_v32  ;;  %v441_v8 = vsel %vm185_vm5, 1.0, %v620_v32  ;;  %v442_v9 = vsel %vm186_vm6, 1.0, %v620_v32  ;;  %v443_v10 = vsel %vm187_vm7, 1.0, %v620_v32 }
  0x44   : > { %v196_v11 = vadd.f32 %v440_v7, %v174_v2  ;;  %v197_v15 = vadd.f32 %v441_v8, %v175_v3  ;;  %v198_v16 = vadd.f32 %v442_v9, %v176_v4  ;;  %v199_v17 = vadd.f32 %v443_v10, %v177_v6  ;;  %v257_v2 = vld [vmem:[#allocation2 + $0x28] sm:$0xff] (%p56_p2) }
  0x45   : > { %vm206_vm8 = vcmp.eq.s32.totalorder %v705_v30, %v689_v5  ;;  %vm207_vm9 = vcmp.eq.s32.totalorder %v705_v30, %v694_v12  ;;  %vm208_vm10 = vcmp.eq.s32.totalorder %v705_v30, %v697_v13  ;;  %vm209_vm11 = vcmp.eq.s32.totalorder %v705_v30, %v700_v14 }
  0x46   : > { %v444_v18 = vsel %vm206_vm8, 1.0, %v620_v32  ;;  %v445_v19 = vsel %vm207_vm9, 1.0, %v620_v32  ;;  %v446_v20 = vsel %vm208_vm10, 1.0, %v620_v32  ;;  %v447_v21 = vsel %vm209_vm11, 1.0, %v620_v32 }
  0x47   : > { %v218_v22 = vadd.f32 %v444_v18, %v196_v11  ;;  %v219_v23 = vadd.f32 %v445_v19, %v197_v15  ;;  %v220_v24 = vadd.f32 %v446_v20, %v198_v16  ;;  %v221_v25 = vadd.f32 %v447_v21, %v199_v17 }
  0x48   : > { %vm228_vm12 = vcmp.eq.s32.totalorder %v707_v31, %v689_v5  ;;  %vm229_vm13 = vcmp.eq.s32.totalorder %v707_v31, %v694_v12  ;;  %vm230_vm14 = vcmp.eq.s32.totalorder %v707_v31, %v697_v13  ;;  %vm231_vm15 = vcmp.eq.s32.totalorder %v707_v31, %v700_v14  ;;  %58 = sbr.rel (!%p56_p2) target bundleno = 44 (0x2c), region = 56 }
  0x49   : > { %v448_v26 = vsel %vm228_vm12, 1.0, %v620_v32  ;;  %v449_v27 = vsel %vm229_vm13, 1.0, %v620_v32  ;;  %v450_v28 = vsel %vm230_vm14, 1.0, %v620_v32  ;;  %v451_v29 = vsel %vm231_vm15, 1.0, %v620_v32 }
  0x4a   : > { %v240_v30 = vadd.f32 %v448_v26, %v218_v22  ;;  %v241_v5 = vadd.f32 %v449_v27, %v219_v23  ;;  %v242_v33 = vadd.f32 %v450_v28, %v220_v24  ;;  %v243_v34 = vadd.f32 %v451_v29, %v221_v25 }
  0x4b   :  { %vm621_vm0 = vmmov (%p56_p2), 0   ;;  %v384_v22 = vstv (%p56_p2), %s383_s15 }
  0x4c   : > { %v244_v12 = vpack.c.bf16 %v241_v5, %v240_v30  ;;  %v245_v35 = vpack.c.bf16 %v243_v34, %v242_v33  ;;  %484 = vmatprep.mubr.msk.bf16.mxu0 (%p56_p2), %vm621_vm0, %v619_v0  ;;  %488 = vmatprep.mubr.msk.bf16.mxu1 (%p56_p2), %vm621_vm0, %v619_v0 }
  0x4e   : > { %250 = vst [vmem:[%s249_s14] sm:$0xff] %v244_v12  ;;  %251 = vst [vmem:[%s249_s14 + $0x8] sm:$0xff] %v245_v35 }
  0x55   :  { %v264_v13 = vld [vmem:[#allocation3] sm:$0xff]  ;;  %v265_v14 = vld [vmem:[#allocation3 + $0x8] sm:$0xff]  ;;  %v266_v31 = vld [vmem:[#allocation3 + $0x10] sm:$0xff] }
  0x56   :  { %469 = vmatpush3.bf16.msra.mxu0 %v264_v13  ;;  %504 = vmatpush3.bf16.msra.mxu1 %v264_v13  ;;  %v267_v32 = vld [vmem:[#allocation3 + $0x18] sm:$0xff]  ;;  %v268_v36 = vld [vmem:[#allocation3 + $0x20] sm:$0xff]  ;;  %v269_v37 = vld [vmem:[#allocation3 + $0x28] sm:$0xff] }
  0x57   :  { %470 = vmatprep.subr.bf16.mxu0 %v619_v0  ;;  %497 = vmatprep.subr.bf16.mxu1 %v619_v0  ;;  %v270_v38 = vld [vmem:[#allocation3 + $0x30] sm:$0xff]  ;;  %v271_v39 = vld [vmem:[#allocation3 + $0x38] sm:$0xff] }
  0x5a   :  { %471 = vmatpush3.bf16.msra.mxu0 %v265_v14  ;;  %505 = vmatpush3.bf16.msra.mxu1 %v265_v14 }
  0x5b   :  { %472 = vmatprep.subr.bf16.mxu0 %v619_v0  ;;  %498 = vmatprep.subr.bf16.mxu1 %v619_v0 }
  0x5e   :  { %473 = vmatpush3.bf16.msra.mxu0 %v266_v31  ;;  %506 = vmatpush3.bf16.msra.mxu1 %v266_v31 }
  0x5f   :  { %474 = vmatprep.subr.bf16.mxu0 %v619_v0  ;;  %499 = vmatprep.subr.bf16.mxu1 %v619_v0 }
  0x62   :  { %475 = vmatpush3.bf16.msra.mxu0 %v267_v32  ;;  %507 = vmatpush3.bf16.msra.mxu1 %v267_v32 }
  0x63   :  { %476 = vmatprep.subr.bf16.mxu0 %v619_v0  ;;  %500 = vmatprep.subr.bf16.mxu1 %v619_v0 }
  0x66   :  { %477 = vmatpush3.bf16.msra.mxu0 %v268_v36  ;;  %508 = vmatpush3.bf16.msra.mxu1 %v268_v36 }
  0x67   :  { %478 = vmatprep.subr.bf16.mxu0 %v619_v0  ;;  %501 = vmatprep.subr.bf16.mxu1 %v619_v0 }
  0x6a   :  { %479 = vmatpush3.bf16.msra.mxu0 %v269_v37  ;;  %509 = vmatpush3.bf16.msra.mxu1 %v269_v37 }
  0x6b   :  { %480 = vmatprep.subr.bf16.mxu0 %v619_v0  ;;  %502 = vmatprep.subr.bf16.mxu1 %v619_v0 }
  0x6e   :  { %481 = vmatpush3.bf16.msra.mxu0 %v270_v38  ;;  %510 = vmatpush3.bf16.msra.mxu1 %v270_v38 }
  0x6f   :  { %482 = vmatprep.subr.bf16.mxu0 %v619_v0  ;;  %503 = vmatprep.subr.bf16.mxu1 %v619_v0 }
  0x72   :  { %483 = vmatpush3.bf16.msra.mxu0 %v271_v39  ;;  %511 = vmatpush3.bf16.msra.mxu1 %v271_v39 }
  0x75   :  { %485 = vmatmul.mubr.bf16.vlgmr.msra.gmra.mrb[0].mxu0 %v528_v40  ;;  %489 = vmatmul.mubr.bf16.vlgmr.msra.gmra.mrb[0].mxu1 %v529_v41 }
  0x76   :  { %492 = vmatprep.mubr.msk.bf16.mxu1 %vm621_vm0, %v619_v0 }
  0x7d   :  { %493 = vmatmul.mubr.bf16.gmra.mrb[4].mxu1 %v530_v42 }
 0x148   :  { %v324_v45 = vpop.f32.mrb[0].mxu0  ;;  %v332_v46 = vpop.f32.mrb[0].mxu1 }
 0x149   :  { %v347_v49 = vadd.f32 %v324_v45, %v252_v43  ;;  %v349_v50 = vadd.f32 %v332_v46, %v254_v44  ;;  %v486_v51 = vpop.f32.mrb[1].mxu0  ;;  %v490_v52 = vpop.f32.mrb[1].mxu1 }
 0x14a   :  { %v327_v53 = vpop.f32.mrb[2].mxu0  ;;  %v335_v54 = vpop.f32.mrb[2].mxu1 }
 0x14b   :  { %353 = vst [vmem:[#allocation2] sm:$0xff] %v347_v49  ;;  %355 = vst [vmem:[#allocation2 + $0x10] sm:$0xff] %v349_v50  ;;  %v348_v55 = vadd.f32 %v327_v53, %v253_v47  ;;  %v350_v56 = vadd.f32 %v335_v54, %v255_v48  ;;  %v487_v57 = vpop.f32.mrb[3].mxu0  ;;  %v491_v0 = vpop.f32.mrb[3].mxu1  ;;  %v364_v58 = vmul.f32 %v347_v49, %v347_v49 }
 0x14d   :  { %354 = vst [vmem:[#allocation2 + $0x8] sm:$0xff] %v348_v55  ;;  %356 = vst [vmem:[#allocation2 + $0x18] sm:$0xff] %v350_v56  ;;  %v365_v59 = vmul.f32 %v348_v55, %v348_v55  ;;  %v375_v60 = vadd.f32 %v350_v56, %v349_v50 }
 0x14f   :  { %v366_v62 = vadd.f32 %v365_v59, %v364_v58  ;;  %v376_v63 = vrot.slane %v375_v60, 4 }
 0x150   :  { %v340_v1 = vpop.f32.mrb[4].mxu1 }
 0x151   :  { %v351_v3 = vadd.f32 %v340_v1, %v256_v61  ;;  %v494_v4 = vpop.f32.mrb[5].mxu1  ;;  %v367_v6 = vrot.slane %v366_v62, 4  ;;  %v377_v7 = vadd.f32 %v376_v63, %v375_v60 }
 0x152   :  { %v343_v8 = vpop.f32.mrb[6].mxu1 }
 0x153   :  { %357 = vst [vmem:[#allocation2 + $0x20] sm:$0xff] %v351_v3  ;;  %v352_v9 = vadd.f32 %v343_v8, %v257_v2  ;;  %v495_v10 = vpop.f32.mrb[7].mxu1  ;;  %v368_v11 = vadd.f32 %v367_v6, %v366_v62  ;;  %v378_v15 = vrot.slane %v377_v7, 2 }
 0x155   :  { %358 = vst [vmem:[#allocation2 + $0x28] sm:$0xff] %v352_v9  ;;  %v369_v16 = vrot.slane %v368_v11, 2  ;;  %v379_v17 = vadd.f32 %v378_v15, %v377_v7 }
 0x157   :  { %v370_v18 = vadd.f32 %v369_v16, %v368_v11  ;;  %v380_v19 = vrot.slane %v379_v17, 1 }
 0x159   :  { %v371_v20 = vrot.slane %v370_v18, 1  ;;  %v381_v24 = vadd.f32 %v380_v19, %v379_v17 }
 0x15a   :  { %v382_v21 = vld [vmem:[#allocation2 + $0x20] sm:$0x1] }
 0x15b   :  { %v372_v23 = vadd.f32 %v371_v20, %v370_v18  ;;  %v385_v25 = vadd.f32 %v384_v22, %v382_v21 }
 0x15d   :  { %v386_v26 = vsub.f32 %v372_v23, %v381_v24 }
 0x15f   :  { %v387_v27 = vmul.f32 0.5, %v386_v26 }
 0x161   :  { %v388_v28 = vadd.f32 %v387_v27, %v385_v25 }
 0x163   :  { %v456_v29 = vmul.f32 -1.442695, %v388_v28 }
 0x165   :  { %531 = vpow2.f32 %v456_v29 }
 0x16f   :  { %v532_v30 = vpop.eup %531 }
 0x170   :  { %v392_v5 = vadd.f32 1.0, %v532_v30 }
 0x172   :  { %533 = vrcp.f32 %v392_v5 }
 0x17c   :  { %v534_v33 = vpop.eup %533 }
 0x17d   :  { %395 = vst [vmem:[#allocation10] sm:$0x1] %v534_v33 }
 0x17e   :  { %590 = shalt.err (!%p587_p7)
}
 0x17f   :  { %s591_s22 = scalar_lea.hbm %s827_s3, 16 }
 0x180   :  { %p592_p8 = scmp.ne.s32.totalorder %s827_s3, %s591_s22  ;;  %p595_p9 = scmp.lt.u32.totalorder %s591_s22, %s827_s3 }
 0x182   :  { %p597_p10 = pnand %p595_p9, %p592_p8 }
 0x184   :  { %600 = shalt.err (!%p597_p10)
}
 0x185   :  { %405 = dma.vmem_to_hbm [thread:$0]  %s403_s17, 16, %s827_s3, [#allocation7]  }
 0x186   :  { %609 = dma.done.wait [#allocation7], 16  }
 0x187   :  { %610 = vsyncadd [#allocation7], 4294967280 }
 0x188   :  { %409 = vsyncpa [#allocation6], 1 }
 0x189   :  { %410 = vsyncpa [#allocation9], 1 }
 0x18a   :  { %411 = vsyncpa [#allocation7], 1 }

</bundles_post_ra>
